<compile_context>
chip_gen: v5e
topology: v5e:2x2
jax: 0.10.0
libtpu: 0.0.40
codegen_flags: <defaults>
</compile_context>

<pallas_src>
import functools

import jax
import jax.numpy as jnp
import numpy as np
from jax import lax
from jax.experimental import pallas as pl
from jax.experimental.pallas import tpu as pltpu


# ----------------------------------------------------------------------------
# Fused kernel: conv1 -> LReLU -> conv2 -> LReLU -> fc   (NB images per grid step)
# ----------------------------------------------------------------------------
def _discriminator_kernel(xe_ref, xo_ref, w1_ref, b1_ref, w2_ref, b2_ref,
                          fcw_ref, fcb_ref, sel_ref, mlast_ref, mfirst_ref,
                          o_ref, y_ref, *, negative_slope):
    # Per grid step (NB images, M = NB*Ho2 rows):
    #   xe_ref : (M, 4*W*C)    bf16  input slab feeding the EVEN conv1 output rows
    #   xo_ref : (M, 4*W*C)    bf16  input slab feeding the ODD  conv1 output rows
    #   w1_ref : (4*W*C, L1)   bf16  conv1 line-GEMM weight, 4 H-taps stacked in K
    #   b1_ref : (1, L1)       f32
    #   w2_ref : (2, 2*L1, L2) bf16  conv2 line-GEMM weights (lo / hi H-tap pairs)
    #   b2_ref : (1, L2)       f32
    #   fcw_ref: (M, L2)       f32   fc weight (flatten order folded), tiled over NB
    #   fcb_ref: (1, 1)        f32
    #   sel_ref: (NB, M)       f32   0/1 per-image row selector
    #   mlast_ref / mfirst_ref: (M, 1) f32  masks killing cross-image rows
    #   o_ref  : (NB, 1)       f32
    #   y_ref  : (2, M, 2*L1)  f32   VMEM scratch: conv2 operand slabs A_lo / A_hi
    f32 = jnp.float32
    m = xe_ref.shape[0]
    l1 = w1_ref.shape[1]
    cdt = w1_ref.dtype

    def lrelu(v):
        return jnp.where(v >= 0.0, v, negative_slope * v)

    # ---- conv1: both row parities share one K-stacked weight (K = 4*W*C) -------
    w1 = w1_ref[...]
    y1e = lrelu(jnp.dot(xe_ref[...], w1, preferred_element_type=f32) + b1_ref[...])
    y1o = lrelu(jnp.dot(xo_ref[...], w1, preferred_element_type=f32) + b1_ref[...])

    # ---- assemble conv2 operand slabs in VMEM ----------------------------------
    # A_lo row (i,r) = [ y1_odd[i,r-1] | y1_even[i,r]   ]   (zero for r-1 < 0)
    # A_hi row (i,r) = [ y1_odd[i,r]   | y1_even[i,r+1] ]   (zero for r+1 == Ho2)
    # The per-image row shift is done by the store offset; cross-image contamination
    # is killed by the boundary masks; only the 2 never-stored pad half-rows are
    # zeroed (every step -- NOT gated on program_id==0, so this stays correct when
    # the "parallel" grid is sharded across TensorCores, each with its own scratch).
    y_ref[0, 0:1, 0:l1] = jnp.zeros((1, l1), f32)
    y_ref[1, m - 1:m, l1:2 * l1] = jnp.zeros((1, l1), f32)
    y_ref[0, :, l1:2 * l1] = y1e
    y_ref[1, :, 0:l1] = y1o
    y_ref[0, 1:m, 0:l1] = (y1o * mlast_ref[...])[0:m - 1, :]
    y_ref[1, 0:m - 1, l1:2 * l1] = (y1e * mfirst_ref[...])[1:m, :]

    # ---- conv2: two dots with K = 2*L1 (all 4 H-taps folded into K) ------------
    acc2 = jnp.dot(y_ref[0].astype(cdt), w2_ref[0], preferred_element_type=f32)
    acc2 = acc2 + jnp.dot(y_ref[1].astype(cdt), w2_ref[1], preferred_element_type=f32)
    y2 = lrelu(acc2 + b2_ref[...])                                   # (M, L2) f32

    # ---- fc: elementwise fc weight + per-image segment sum + lane reduce (f32) -
    z = y2 * fcw_ref[...]                                            # (M, L2)
    g = jnp.dot(sel_ref[...], z, preferred_element_type=f32)         # (NB, L2)
    o_ref[...] = jnp.sum(g, axis=1, keepdims=True) + fcb_ref[...]    # (NB, 1)


# ----------------------------------------------------------------------------
# One-time parameter packing (hoisted out of the forward path)
# ----------------------------------------------------------------------------
def prepare_params(params, roll_size, hidden_dim, compute_dtype=jnp.bfloat16):
    C, H, W = roll_size
    assert H % 4 == 0 and W % 4 == 0, "line-GEMM layout assumes H, W multiples of 4"
    h1, h2 = hidden_dim, 2 * hidden_dim
    Ho2, Wo1, Wo2 = H // 4, W // 2, W // 4
    WC, L1, L2 = W * C, Wo1 * h1, Wo2 * h2

    w1 = np.asarray(params["conv1_w"], np.float32)        # (h1, C, 4, 4) OIHW
    w2 = np.asarray(params["conv2_w"], np.float32)        # (h2, h1, 4, 4)

    # conv1 line-GEMM weight: all 4 H-taps stacked along K (lane index of the input
    # slab is kh*WC + w*C + c); W-taps, stride-2 and W-padding folded into the band.
    # The SAME matrix serves the even and odd output-row passes (the wrapper feeds
    # two pre-shifted input slabs).
    W1s = np.zeros((4 * WC, L1), np.float32)
    for kh in range(4):
        for kw in range(4):
            blk = w1[:, :, kh, kw].T                       # (C, h1)
            for wo in range(Wo1):
                wi = 2 * wo + kw - 1                       # padding = 1
                if 0 <= wi < W:
                    W1s[kh * WC + wi * C: kh * WC + (wi + 1) * C,
                        wo * h1:(wo + 1) * h1] = blk

    # conv2 line-GEMM weights: taps (0,1) -> slab "lo", taps (2,3) -> slab "hi";
    # within a slab the two taps are stacked along K, matching the [odd|even]
    # lane layout of the A_lo / A_hi scratch slabs built inside the kernel.
    W2s = np.zeros((2, 2 * L1, L2), np.float32)
    for kh in range(4):
        for kw in range(4):
            blk = w2[:, :, kh, kw].T                       # (h1, h2)
            for wo in range(Wo2):
                wi = 2 * wo + kw - 1
                if 0 <= wi < Wo1:
                    W2s[kh // 2,
                        (kh % 2) * L1 + wi * h1:(kh % 2) * L1 + (wi + 1) * h1,
                        wo * h2:(wo + 1) * h2] = blk

    b1 = np.tile(np.asarray(params["conv1_b"], np.float32), Wo1)[None, :]
    b2 = np.tile(np.asarray(params["conv2_b"], np.float32), Wo2)[None, :]

    # Fold torch's x.view(N,-1) order (co, ho, wo) into the fc-weight layout
    # (ho rows, wo*h2 + co lanes) that matches the kernel's y2 layout.
    fcw = np.asarray(params["fc_w"], np.float32).reshape(h2, Ho2, Wo2)
    fcw = np.transpose(fcw, (1, 2, 0)).reshape(Ho2, L2)
    fcb = np.asarray(params["fc_b"], np.float32).reshape(1, 1)

    return {
        "w1": jnp.asarray(W1s, compute_dtype),
        "b1": jnp.asarray(b1, jnp.float32),
        "w2": jnp.asarray(W2s, compute_dtype),
        "b2": jnp.asarray(b2, jnp.float32),
        "fcw": jnp.asarray(fcw, jnp.float32),
        "fcb": jnp.asarray(fcb, jnp.float32),
    }


# ----------------------------------------------------------------------------
# Forward pass: cheap input layout prep + one fused pallas_call
# ----------------------------------------------------------------------------
def discriminator_cnn_forward(packed, image_nchw, *, roll_size, hidden_dim,
                              block_batch=None, compute_dtype=jnp.bfloat16):
    C, H, W = roll_size
    assert H % 4 == 0 and W % 4 == 0, "line-GEMM layout assumes H, W multiples of 4"
    N = image_nchw.shape[0]
    h1, h2 = hidden_dim, 2 * hidden_dim
    Ho2, Wo1, Wo2 = H // 4, W // 2, W // 4
    WC, L1, L2 = W * C, Wo1 * h1, Wo2 * h2

    # ---- batch folding: NB images per grid step so MXU matmuls have M ~= 128 ----
    if block_batch is None:
        nb = max(1, min(128 // max(Ho2, 1), N))
        if N > 1 and nb >= N:        # keep >= 2 grid steps (v7x has 2 TensorCores)
            nb = -(-N // 2)
    else:
        nb = max(1, int(block_batch))
    G = -(-N // nb)
    if G > 1 and nb % 8 != 0:        # (nb, 1) output block wants sublane-aligned nb
        nb = ((nb + 7) // 8) * 8
        G = -(-N // nb)
    n_pad = G * nb
    M = nb * Ho2

    # ---- input layout prep (tiny at these sizes; no im2col) --------------------
    # NCHW -> rows of (w, c); pad H by 1/1; take the two H-phase views so every
    # conv1 operand inside the kernel is one contiguous (M, 4*W*C) slab.
    x = jnp.transpose(image_nchw, (0, 2, 3, 1)).reshape(N, H, WC).astype(compute_dtype)
    x = jnp.pad(x, ((0, n_pad - N), (1, 1), (0, 0)))          # (n_pad, H+2, WC)
    x_even = x[:, 0:H, :].reshape(n_pad * Ho2, 4 * WC)        # padded rows 4r..4r+3
    x_odd = x[:, 2:H + 2, :].reshape(n_pad * Ho2, 4 * WC)     # padded rows 4r+2..4r+5

    # Compile-time constants: per-image row selector + image-boundary masks.
    sel = jnp.asarray(np.kron(np.eye(nb, dtype=np.float32),
                              np.ones((1, Ho2), np.float32)))            # (nb, M)
    r_idx = np.arange(M) % Ho2
    mask_last = jnp.asarray((r_idx != Ho2 - 1).astype(np.float32).reshape(M, 1))
    mask_first = jnp.asarray((r_idx != 0).astype(np.float32).reshape(M, 1))
    fcw_tiled = jnp.tile(packed["fcw"], (nb, 1))                          # (M, L2)

    flops = int(n_pad * (2 * (2 * Ho2 * (4 * WC) * L1)        # conv1 even + odd
                         + 2 * (2 * Ho2 * (2 * L1) * L2)      # conv2 lo + hi
                         + 3 * Ho2 * L2)                      # fc epilogue
                + G * 2 * nb * M * L2)                        # selector matmul
    bytes_accessed = int(
        2 * x_even.size * x_even.dtype.itemsize
        + sum(int(np.prod(v.shape)) * v.dtype.itemsize for v in packed.values())
        + n_pad * 4)

    out = pl.pallas_call(
        functools.partial(_discriminator_kernel, negative_slope=0.2),
        out_shape=jax.ShapeDtypeStruct((n_pad, 1), jnp.float32),
        grid=(G,),
        in_specs=[
            pl.BlockSpec((M, 4 * WC), lambda g: (g, 0)),          # x_even
            pl.BlockSpec((M, 4 * WC), lambda g: (g, 0)),          # x_odd
            pl.BlockSpec((4 * WC, L1), lambda g: (0, 0)),         # w1 (K-stacked)
            pl.BlockSpec((1, L1), lambda g: (0, 0)),              # b1
            pl.BlockSpec((2, 2 * L1, L2), lambda g: (0, 0, 0)),   # w2 (lo/hi)
            pl.BlockSpec((1, L2), lambda g: (0, 0)),              # b2
            pl.BlockSpec((M, L2), lambda g: (0, 0)),              # fc weight (tiled)
            pl.BlockSpec((1, 1), lambda g: (0, 0)),               # fc bias
            pl.BlockSpec((nb, M), lambda g: (0, 0)),              # selector
            pl.BlockSpec((M, 1), lambda g: (0, 0)),               # mask_last
            pl.BlockSpec((M, 1), lambda g: (0, 0)),               # mask_first
        ],
        out_specs=pl.BlockSpec((nb, 1), lambda g: (g, 0)),
        scratch_shapes=[pltpu.VMEM((2, M, 2 * L1), jnp.float32)],
        compiler_params=pltpu.CompilerParams(
            dimension_semantics=("parallel",),
            vmem_limit_bytes=32 * 1024 * 1024),
        cost_estimate=pl.CostEstimate(flops=flops, transcendentals=0,
                                      bytes_accessed=bytes_accessed),
    )(x_even, x_odd, packed["w1"], packed["b1"], packed["w2"], packed["b2"],
      fcw_tiled, packed["fcb"], sel, mask_last, mask_first)
    return out[:N]


# ----------------------------------------------------------------------------
# Deterministic torch-shaped parameters + pure-JAX reference
# ----------------------------------------------------------------------------
def init_params(key, roll_size, hidden_dim):
    c_in, h_img, w_img = roll_size
    k1, k2, k3, k4, k5, k6 = jax.random.split(key, 6)
    final_size = hidden_dim * 2 * (h_img // 4) * (w_img // 4)
    return {
        "conv1_w": 0.05 * jax.random.normal(k1, (hidden_dim, c_in, 4, 4), jnp.float32),
        "conv1_b": 0.05 * jax.random.normal(k2, (hidden_dim,), jnp.float32),
        "conv2_w": 0.05 * jax.random.normal(k3, (hidden_dim * 2, hidden_dim, 4, 4), jnp.float32),
        "conv2_b": 0.05 * jax.random.normal(k4, (hidden_dim * 2,), jnp.float32),
        "fc_w": 0.05 * jax.random.normal(k5, (1, final_size), jnp.float32),
        "fc_b": 0.05 * jax.random.normal(k6, (1,), jnp.float32),
    }


def reference_forward(params, image_nchw):
    def conv(x, w, b):
        y = lax.conv_general_dilated(
            x, w, window_strides=(2, 2), padding=((1, 1), (1, 1)),
            dimension_numbers=("NCHW", "OIHW", "NCHW"),
            precision=lax.Precision.HIGHEST)
        return y + b[None, :, None, None]

    lrelu = lambda v: jnp.where(v >= 0, v, 0.2 * v)
    x = lrelu(conv(image_nchw, params["conv1_w"], params["conv1_b"]))
    x = lrelu(conv(x, params["conv2_w"], params["conv2_b"]))
    flat = x.reshape(x.shape[0], -1)
    return flat @ params["fc_w"].T + params["fc_b"]


if __name__ == "__main__":
    # Small shapes consistent with the module: roll_size=(C=2, H=16, W=16), hidden_dim=8.
    # batch=16 -> NB=8 images per grid step (M = 32 MXU rows), 2 grid steps.
    roll_size = (2, 16, 16)
    hidden_dim = 8
    batch = 16

    key = jax.random.PRNGKey(0)
    k_params, k_input = jax.random.split(key)
    params = init_params(k_params, roll_size, hidden_dim)
    image = jax.random.normal(k_input, (batch,) + roll_size, jnp.float32)   # NCHW

    packed = prepare_params(params, roll_size, hidden_dim, jnp.bfloat16)
    fwd = jax.jit(functools.partial(discriminator_cnn_forward,
                                    roll_size=roll_size, hidden_dim=hidden_dim,
                                    compute_dtype=jnp.bfloat16))
    out = jax.block_until_ready(fwd(packed, image))

    ref = reference_forward(params, image)
    # bf16 MXU operands (f32 accumulation / scratch / epilogues) vs. f32-HIGHEST ref.
    np.testing.assert_allclose(np.asarray(out), np.asarray(ref),
                               rtol=2e-2, atol=1e-2)
    assert out.shape == (batch, 1)

    print("KERNEL_OK")
</pallas_src>

<mosaic_0001>
module attributes {stable_mosaic.version = 11 : i64} {
  func.func @_discriminator_kernel(%arg0: i32, %arg1: memref<32x128xbf16, #tpu.memory_space<vmem>>, %arg2: memref<32x128xbf16, #tpu.memory_space<vmem>>, %arg3: memref<128x64xbf16, #tpu.memory_space<vmem>>, %arg4: memref<1x64xf32, #tpu.memory_space<vmem>>, %arg5: memref<2x128x64xbf16, #tpu.memory_space<vmem>>, %arg6: memref<1x64xf32, #tpu.memory_space<vmem>>, %arg7: memref<32x64xf32, #tpu.memory_space<vmem>>, %arg8: memref<1x1xf32, #tpu.memory_space<vmem>>, %arg9: memref<8x32xf32, #tpu.memory_space<vmem>>, %arg10: memref<32x1xf32, #tpu.memory_space<vmem>>, %arg11: memref<32x1xf32, #tpu.memory_space<vmem>>, %arg12: memref<8x1xf32, #tpu.memory_space<vmem>>, %arg13: memref<2x32x128xf32, #tpu.memory_space<vmem>>) attributes {dimension_semantics = [#tpu.dimension_semantics<parallel>], iteration_bounds = array<i64: 2>, scalar_prefetch = 0 : i64, scratch_operands = 1 : i64, tpu.core_type = #tpu.core_type<tc>, window_params = [{transform_indices = @transform_0, window_bounds = array<i64: 32, 128>}, {transform_indices = @transform_1, window_bounds = array<i64: 32, 128>}, {pipeline_mode = #tpu.pipeline_mode<synchronous>, transform_indices = @transform_2, window_bounds = array<i64: 128, 64>}, {pipeline_mode = #tpu.pipeline_mode<synchronous>, transform_indices = @transform_3, window_bounds = array<i64: 1, 64>}, {pipeline_mode = #tpu.pipeline_mode<synchronous>, transform_indices = @transform_4, window_bounds = array<i64: 2, 128, 64>}, {pipeline_mode = #tpu.pipeline_mode<synchronous>, transform_indices = @transform_5, window_bounds = array<i64: 1, 64>}, {pipeline_mode = #tpu.pipeline_mode<synchronous>, transform_indices = @transform_6, window_bounds = array<i64: 32, 64>}, {pipeline_mode = #tpu.pipeline_mode<synchronous>, transform_indices = @transform_7, window_bounds = array<i64: 1, 1>}, {pipeline_mode = #tpu.pipeline_mode<synchronous>, transform_indices = @transform_8, window_bounds = array<i64: 8, 32>}, {pipeline_mode = #tpu.pipeline_mode<synchronous>, transform_indices = @transform_9, window_bounds = array<i64: 32, 1>}, {pipeline_mode = #tpu.pipeline_mode<synchronous>, transform_indices = @transform_10, window_bounds = array<i64: 32, 1>}, {transform_indices = @transform_11, window_bounds = array<i64: 8, 1>}]} {
    %c0 = arith.constant 0 : index
    %c0_0 = arith.constant 0 : index
    %0 = vector.load %arg3[%c0, %c0_0] : memref<128x64xbf16, #tpu.memory_space<vmem>>, vector<128x64xbf16>
    %c0_1 = arith.constant 0 : index
    %c0_2 = arith.constant 0 : index
    %1 = vector.load %arg1[%c0_1, %c0_2] : memref<32x128xbf16, #tpu.memory_space<vmem>>, vector<32x128xbf16>
    %cst = arith.constant dense<0.000000e+00> : vector<32x64xf32>
    %2 = tpu.matmul %1, %0, %cst {dimension_numbers = #tpu.dot_dimension_numbers<[1], [0], [0], [1], [0, 0, 1, 1], [], []>} : vector<32x128xbf16>, vector<128x64xbf16>, vector<32x64xf32> -> vector<32x64xf32>
    %c0_3 = arith.constant 0 : index
    %c0_4 = arith.constant 0 : index
    %3 = vector.load %arg4[%c0_3, %c0_4] : memref<1x64xf32, #tpu.memory_space<vmem>>, vector<1x64xf32>
    %4 = vector.broadcast %3 : vector<1x64xf32> to vector<32x64xf32>
    %5 = arith.addf %2, %4 : vector<32x64xf32>
    %cst_5 = arith.constant 0.000000e+00 : f32
    %6 = vector.broadcast %cst_5 : f32 to vector<32x64xf32>
    %7 = arith.cmpf oge, %5, %6 : vector<32x64xf32>
    %cst_6 = arith.constant 2.000000e-01 : f32
    %8 = vector.broadcast %cst_6 : f32 to vector<32x64xf32>
    %9 = arith.mulf %8, %5 : vector<32x64xf32>
    %10 = arith.select %7, %5, %9 : vector<32x64xi1>, vector<32x64xf32>
    %c0_7 = arith.constant 0 : index
    %c0_8 = arith.constant 0 : index
    %11 = vector.load %arg2[%c0_7, %c0_8] : memref<32x128xbf16, #tpu.memory_space<vmem>>, vector<32x128xbf16>
    %cst_9 = arith.constant dense<0.000000e+00> : vector<32x64xf32>
    %12 = tpu.matmul %11, %0, %cst_9 {dimension_numbers = #tpu.dot_dimension_numbers<[1], [0], [0], [1], [0, 0, 1, 1], [], []>} : vector<32x128xbf16>, vector<128x64xbf16>, vector<32x64xf32> -> vector<32x64xf32>
    %c0_10 = arith.constant 0 : index
    %c0_11 = arith.constant 0 : index
    %13 = vector.load %arg4[%c0_10, %c0_11] : memref<1x64xf32, #tpu.memory_space<vmem>>, vector<1x64xf32>
    %14 = vector.broadcast %13 : vector<1x64xf32> to vector<32x64xf32>
    %15 = arith.addf %12, %14 : vector<32x64xf32>
    %cst_12 = arith.constant 0.000000e+00 : f32
    %16 = vector.broadcast %cst_12 : f32 to vector<32x64xf32>
    %17 = arith.cmpf oge, %15, %16 : vector<32x64xf32>
    %cst_13 = arith.constant 2.000000e-01 : f32
    %18 = vector.broadcast %cst_13 : f32 to vector<32x64xf32>
    %19 = arith.mulf %18, %15 : vector<32x64xf32>
    %20 = arith.select %17, %15, %19 : vector<32x64xi1>, vector<32x64xf32>
    %cst_14 = arith.constant 0.000000e+00 : f32
    %21 = vector.broadcast %cst_14 : f32 to vector<1x64xf32>
    %c0_15 = arith.constant 0 : index
    %c0_16 = arith.constant 0 : index
    %c0_17 = arith.constant 0 : index
    %22 = vector.load %arg13[%c0_15, %c0_16, %c0_17] : memref<2x32x128xf32, #tpu.memory_space<vmem>>, vector<1x1x64xf32>
    %23 = vector.shape_cast %22 : vector<1x1x64xf32> to vector<1x64xf32>
    %24 = vector.shape_cast %21 : vector<1x64xf32> to vector<1x1x64xf32>
    tpu.vector_store %arg13[%c0_15, %c0_16, %c0_17], %24 {strides = array<i32>} : memref<2x32x128xf32, #tpu.memory_space<vmem>>, vector<1x1x64xf32>,
    %cst_18 = arith.constant 0.000000e+00 : f32
    %25 = vector.broadcast %cst_18 : f32 to vector<1x64xf32>
    %c1 = arith.constant 1 : index
    %c31 = arith.constant 31 : index
    %c64 = arith.constant 64 : index
    %26 = vector.load %arg13[%c1, %c31, %c64] : memref<2x32x128xf32, #tpu.memory_space<vmem>>, vector<1x1x64xf32>
    %27 = vector.shape_cast %26 : vector<1x1x64xf32> to vector<1x64xf32>
    %28 = vector.shape_cast %25 : vector<1x64xf32> to vector<1x1x64xf32>
    tpu.vector_store %arg13[%c1, %c31, %c64], %28 {strides = array<i32>} : memref<2x32x128xf32, #tpu.memory_space<vmem>>, vector<1x1x64xf32>,
    %c0_19 = arith.constant 0 : index
    %c0_20 = arith.constant 0 : index
    %c64_21 = arith.constant 64 : index
    %29 = vector.load %arg13[%c0_19, %c0_20, %c64_21] : memref<2x32x128xf32, #tpu.memory_space<vmem>>, vector<1x32x64xf32>
    %30 = vector.shape_cast %29 : vector<1x32x64xf32> to vector<32x64xf32>
    %31 = vector.shape_cast %10 : vector<32x64xf32> to vector<1x32x64xf32>
    tpu.vector_store %arg13[%c0_19, %c0_20, %c64_21], %31 {strides = array<i32>} : memref<2x32x128xf32, #tpu.memory_space<vmem>>, vector<1x32x64xf32>,
    %c1_22 = arith.constant 1 : index
    %c0_23 = arith.constant 0 : index
    %c0_24 = arith.constant 0 : index
    %32 = vector.load %arg13[%c1_22, %c0_23, %c0_24] : memref<2x32x128xf32, #tpu.memory_space<vmem>>, vector<1x32x64xf32>
    %33 = vector.shape_cast %32 : vector<1x32x64xf32> to vector<32x64xf32>
    %34 = vector.shape_cast %20 : vector<32x64xf32> to vector<1x32x64xf32>
    tpu.vector_store %arg13[%c1_22, %c0_23, %c0_24], %34 {strides = array<i32>} : memref<2x32x128xf32, #tpu.memory_space<vmem>>, vector<1x32x64xf32>,
    %c0_25 = arith.constant 0 : index
    %c0_26 = arith.constant 0 : index
    %35 = vector.load %arg10[%c0_25, %c0_26] : memref<32x1xf32, #tpu.memory_space<vmem>>, vector<32x1xf32>
    %36 = vector.broadcast %35 : vector<32x1xf32> to vector<32x64xf32>
    %37 = arith.mulf %20, %36 : vector<32x64xf32>
    %38 = vector.extract_strided_slice %37 {offsets = [0, 0], sizes = [31, 64], strides = [1, 1]} : vector<32x64xf32> to vector<31x64xf32>
    %c0_27 = arith.constant 0 : index
    %c1_28 = arith.constant 1 : index
    %c0_29 = arith.constant 0 : index
    %39 = vector.load %arg13[%c0_27, %c1_28, %c0_29] : memref<2x32x128xf32, #tpu.memory_space<vmem>>, vector<1x31x64xf32>
    %40 = vector.shape_cast %39 : vector<1x31x64xf32> to vector<31x64xf32>
    %41 = vector.shape_cast %38 : vector<31x64xf32> to vector<1x31x64xf32>
    tpu.vector_store %arg13[%c0_27, %c1_28, %c0_29], %41 {strides = array<i32>} : memref<2x32x128xf32, #tpu.memory_space<vmem>>, vector<1x31x64xf32>,
    %c0_30 = arith.constant 0 : index
    %c0_31 = arith.constant 0 : index
    %42 = vector.load %arg11[%c0_30, %c0_31] : memref<32x1xf32, #tpu.memory_space<vmem>>, vector<32x1xf32>
    %43 = vector.broadcast %42 : vector<32x1xf32> to vector<32x64xf32>
    %44 = arith.mulf %10, %43 : vector<32x64xf32>
    %45 = vector.extract_strided_slice %44 {offsets = [1, 0], sizes = [31, 64], strides = [1, 1]} : vector<32x64xf32> to vector<31x64xf32>
    %c1_32 = arith.constant 1 : index
    %c0_33 = arith.constant 0 : index
    %c64_34 = arith.constant 64 : index
    %46 = vector.load %arg13[%c1_32, %c0_33, %c64_34] : memref<2x32x128xf32, #tpu.memory_space<vmem>>, vector<1x31x64xf32>
    %47 = vector.shape_cast %46 : vector<1x31x64xf32> to vector<31x64xf32>
    %48 = vector.shape_cast %45 : vector<31x64xf32> to vector<1x31x64xf32>
    tpu.vector_store %arg13[%c1_32, %c0_33, %c64_34], %48 {strides = array<i32>} : memref<2x32x128xf32, #tpu.memory_space<vmem>>, vector<1x31x64xf32>,
    %c0_35 = arith.constant 0 : index
    %c0_36 = arith.constant 0 : index
    %c0_37 = arith.constant 0 : index
    %49 = vector.load %arg13[%c0_35, %c0_36, %c0_37] : memref<2x32x128xf32, #tpu.memory_space<vmem>>, vector<1x32x128xf32>
    %50 = vector.shape_cast %49 : vector<1x32x128xf32> to vector<32x128xf32>
    %51 = arith.truncf %50 : vector<32x128xf32> to vector<32x128xbf16>
    %c0_38 = arith.constant 0 : index
    %c0_39 = arith.constant 0 : index
    %c0_40 = arith.constant 0 : index
    %52 = vector.load %arg5[%c0_38, %c0_39, %c0_40] : memref<2x128x64xbf16, #tpu.memory_space<vmem>>, vector<1x128x64xbf16>
    %53 = vector.shape_cast %52 : vector<1x128x64xbf16> to vector<128x64xbf16>
    %cst_41 = arith.constant dense<0.000000e+00> : vector<32x64xf32>
    %54 = tpu.matmul %51, %53, %cst_41 {dimension_numbers = #tpu.dot_dimension_numbers<[1], [0], [0], [1], [0, 0, 1, 1], [], []>} : vector<32x128xbf16>, vector<128x64xbf16>, vector<32x64xf32> -> vector<32x64xf32>
    %c1_42 = arith.constant 1 : index
    %c0_43 = arith.constant 0 : index
    %c0_44 = arith.constant 0 : index
    %55 = vector.load %arg13[%c1_42, %c0_43, %c0_44] : memref<2x32x128xf32, #tpu.memory_space<vmem>>, vector<1x32x128xf32>
    %56 = vector.shape_cast %55 : vector<1x32x128xf32> to vector<32x128xf32>
    %57 = arith.truncf %56 : vector<32x128xf32> to vector<32x128xbf16>
    %c1_45 = arith.constant 1 : index
    %c0_46 = arith.constant 0 : index
    %c0_47 = arith.constant 0 : index
    %58 = vector.load %arg5[%c1_45, %c0_46, %c0_47] : memref<2x128x64xbf16, #tpu.memory_space<vmem>>, vector<1x128x64xbf16>
    %59 = vector.shape_cast %58 : vector<1x128x64xbf16> to vector<128x64xbf16>
    %cst_48 = arith.constant dense<0.000000e+00> : vector<32x64xf32>
    %60 = tpu.matmul %57, %59, %cst_48 {dimension_numbers = #tpu.dot_dimension_numbers<[1], [0], [0], [1], [0, 0, 1, 1], [], []>} : vector<32x128xbf16>, vector<128x64xbf16>, vector<32x64xf32> -> vector<32x64xf32>
    %61 = arith.addf %54, %60 : vector<32x64xf32>
    %c0_49 = arith.constant 0 : index
    %c0_50 = arith.constant 0 : index
    %62 = vector.load %arg6[%c0_49, %c0_50] : memref<1x64xf32, #tpu.memory_space<vmem>>, vector<1x64xf32>
    %63 = vector.broadcast %62 : vector<1x64xf32> to vector<32x64xf32>
    %64 = arith.addf %61, %63 : vector<32x64xf32>
    %cst_51 = arith.constant 0.000000e+00 : f32
    %65 = vector.broadcast %cst_51 : f32 to vector<32x64xf32>
    %66 = arith.cmpf oge, %64, %65 : vector<32x64xf32>
    %cst_52 = arith.constant 2.000000e-01 : f32
    %67 = vector.broadcast %cst_52 : f32 to vector<32x64xf32>
    %68 = arith.mulf %67, %64 : vector<32x64xf32>
    %69 = arith.select %66, %64, %68 : vector<32x64xi1>, vector<32x64xf32>
    %c0_53 = arith.constant 0 : index
    %c0_54 = arith.constant 0 : index
    %70 = vector.load %arg7[%c0_53, %c0_54] : memref<32x64xf32, #tpu.memory_space<vmem>>, vector<32x64xf32>
    %71 = arith.mulf %69, %70 : vector<32x64xf32>
    %c0_55 = arith.constant 0 : index
    %c0_56 = arith.constant 0 : index
    %72 = vector.load %arg9[%c0_55, %c0_56] : memref<8x32xf32, #tpu.memory_space<vmem>>, vector<8x32xf32>
    %cst_57 = arith.constant dense<0.000000e+00> : vector<8x64xf32>
    %73 = tpu.matmul %72, %71, %cst_57 {dimension_numbers = #tpu.dot_dimension_numbers<[1], [0], [0], [1], [0, 0, 1, 1], [], []>} : vector<8x32xf32>, vector<32x64xf32>, vector<8x64xf32> -> vector<8x64xf32>
    %cst_58 = arith.constant dense<0.000000e+00> : vector<8xf32>
    %74 = vector.multi_reduction <add>, %73, %cst_58 [1] : vector<8x64xf32> to vector<8xf32>
    %75 = vector.shape_cast %74 : vector<8xf32> to vector<8x1xf32>
    %c0_59 = arith.constant 0 : index
    %c0_60 = arith.constant 0 : index
    %76 = vector.load %arg8[%c0_59, %c0_60] : memref<1x1xf32, #tpu.memory_space<vmem>>, vector<1x1xf32>
    %77 = vector.broadcast %76 : vector<1x1xf32> to vector<8x1xf32>
    %78 = arith.addf %75, %77 : vector<8x1xf32>
    %c0_61 = arith.constant 0 : index
    %c0_62 = arith.constant 0 : index
    %79 = vector.load %arg12[%c0_61, %c0_62] : memref<8x1xf32, #tpu.memory_space<vmem>>, vector<8x1xf32>
    tpu.vector_store %arg12[%c0_61, %c0_62], %78 {strides = array<i32>} : memref<8x1xf32, #tpu.memory_space<vmem>>, vector<8x1xf32>,
    return
  }
  func.func @transform_0(%arg0: i32) -> (i32, i32) {
    %c0_i32 = arith.constant 0 : i32
    %c0_i32_0 = arith.constant 0 : i32
    return %arg0, %c0_i32 : i32, i32
  }
  func.func @transform_1(%arg0: i32) -> (i32, i32) {
    %c0_i32 = arith.constant 0 : i32
    %c0_i32_0 = arith.constant 0 : i32
    return %arg0, %c0_i32 : i32, i32
  }
  func.func @transform_2(%arg0: i32) -> (i32, i32) {
    %c0_i32 = arith.constant 0 : i32
    %c0_i32_0 = arith.constant 0 : i32
    %c0_i32_1 = arith.constant 0 : i32
    return %c0_i32, %c0_i32_0 : i32, i32
  }
  func.func @transform_3(%arg0: i32) -> (i32, i32) {
    %c0_i32 = arith.constant 0 : i32
    %c0_i32_0 = arith.constant 0 : i32
    %c0_i32_1 = arith.constant 0 : i32
    return %c0_i32, %c0_i32_0 : i32, i32
  }
  func.func @transform_4(%arg0: i32) -> (i32, i32, i32) {
    %c0_i32 = arith.constant 0 : i32
    %c0_i32_0 = arith.constant 0 : i32
    %c0_i32_1 = arith.constant 0 : i32
    %c0_i32_2 = arith.constant 0 : i32
    return %c0_i32, %c0_i32_0, %c0_i32_1 : i32, i32, i32
  }
  func.func @transform_5(%arg0: i32) -> (i32, i32) {
    %c0_i32 = arith.constant 0 : i32
    %c0_i32_0 = arith.constant 0 : i32
    %c0_i32_1 = arith.constant 0 : i32
    return %c0_i32, %c0_i32_0 : i32, i32
  }
  func.func @transform_6(%arg0: i32) -> (i32, i32) {
    %c0_i32 = arith.constant 0 : i32
    %c0_i32_0 = arith.constant 0 : i32
    %c0_i32_1 = arith.constant 0 : i32
    return %c0_i32, %c0_i32_0 : i32, i32
  }
  func.func @transform_7(%arg0: i32) -> (i32, i32) {
    %c0_i32 = arith.constant 0 : i32
    %c0_i32_0 = arith.constant 0 : i32
    %c0_i32_1 = arith.constant 0 : i32
    return %c0_i32, %c0_i32_0 : i32, i32
  }
  func.func @transform_8(%arg0: i32) -> (i32, i32) {
    %c0_i32 = arith.constant 0 : i32
    %c0_i32_0 = arith.constant 0 : i32
    %c0_i32_1 = arith.constant 0 : i32
    return %c0_i32, %c0_i32_0 : i32, i32
  }
  func.func @transform_9(%arg0: i32) -> (i32, i32) {
    %c0_i32 = arith.constant 0 : i32
    %c0_i32_0 = arith.constant 0 : i32
    %c0_i32_1 = arith.constant 0 : i32
    return %c0_i32, %c0_i32_0 : i32, i32
  }
  func.func @transform_10(%arg0: i32) -> (i32, i32) {
    %c0_i32 = arith.constant 0 : i32
    %c0_i32_0 = arith.constant 0 : i32
    %c0_i32_1 = arith.constant 0 : i32
    return %c0_i32, %c0_i32_0 : i32, i32
  }
  func.func @transform_11(%arg0: i32) -> (i32, i32) {
    %c0_i32 = arith.constant 0 : i32
    %c0_i32_0 = arith.constant 0 : i32
    return %arg0, %c0_i32 : i32, i32
  }
}

</mosaic_0001>

<bundles_post_ra>
// kernel: discriminator_cnn_forward.1
= control target key start
LH: loop header
LB: loop body
LE: loop exit
PB: predicated region body
PF: predicated region fallthrough
CT: control target
= control target key end

     0   :  { %s1253_s19 = smov 0   ;;  %s1436_s0 = inlined_call_operand.vmem [shape: bf16[64,128], index: 0, kind: input, shape index: {}]   ;;  %s1437_s1 = inlined_call_operand.vmem [shape: bf16[64,128], index: 1, kind: input, shape index: {}]   ;;  %s1438_s2 = inlined_call_operand.vmem [shape: bf16[128,64], index: 2, kind: input, shape index: {}]   ;;  %s1439_s3 = inlined_call_operand.vmem [shape: f32[1,64], index: 3, kind: input, shape index: {}]   ;;  %s1440_s4 = inlined_call_operand.vmem [shape: bf16[2,128,64], index: 4, kind: input, shape index: {}]   ;;  %s1441_s5 = inlined_call_operand.vmem [shape: f32[1,64], index: 5, kind: input, shape index: {}]   ;;  %s1442_s6 = inlined_call_operand.vmem [shape: f32[32,64], index: 6, kind: input, shape index: {}]   ;;  %s1443_s7 = inlined_call_operand.<no memory space> [shape: f32[1,1], index: 7, kind: input, shape index: {}]   ;;  %s1444_s8 = inlined_call_operand.vmem [shape: f32[8,32], index: 8, kind: input, shape index: {}]   ;;  %s1445_s9 = inlined_call_operand.vmem [shape: f32[32,1], index: 9, kind: input, shape index: {}]   ;;  %s1446_s10 = inlined_call_operand.vmem [shape: f32[32,1], index: 10, kind: input, shape index: {}]   ;;  %s1447_s11 = inlined_call_operand.vmem [shape: f32[16,1], index: 11, kind: output, shape index: {}]  }
   0x1   :  { %v16_v0 = vstv %s1443_s7 }
   0x2   :  { %17 = vst [vmem:[#allocation3] sm:$0x1] %v16_v0 }
   0x3 LB: > { %s1259_s20 = sadd.s32 4294967295, %s1185_s19   ;;  %p997_p0 = scmp.ge.s32.totalorder %s1185_s19, 1  ;;  %s1185_s19 = sphi %s1253_s19, %s23_s19  }
   0x4   : > { %p351_p1 = scmp.lt.s32.totalorder %s1185_s19, 3 }
   0x6   : > { %p352_p2 = pnand %p997_p0, %p351_p1 }
   0x7   : > { %s998_s30 = sshll.u32 (!%p352_p2), %s1259_s20, 2  ;;  %s1188_s7 = smov (!%p352_p2), 64  }
   0x8   : > { %355 = sbr.rel (%p352_p2) target bundleno = 735 (0x2df), region = 64  ;;  %p396_p3 = scmp.lt.s32.totalorder (!%p352_p2), %s998_s30, 7 }
   0x9   : > { %p407_p4 = scmp.lt.s32.totalorder (!%p352_p2), %s1259_s20, 1 }
   0xd   : > { %v1141_v1 = vld [vmem:[%s1438_s2 + $0x38] sm:$0xff]  ;;  %v1140_v2 = vld [vmem:[%s1438_s2 + $0x30] sm:$0xff]  ;;  %v1187_v3 = vmov 0   ;;  %v637_v4 = vld [vmem:[%s1446_s10] sm:$0xff]  ;;  %s1449_s30 = smov (!%p396_p3, %s998_s30), 7  ;;  %vm599_vm5 = vcmask 523264  }
   0xe   : > { %495 = vmatpush.bf16.msra.mxu0 %v1141_v1  ;;  %1173 = vset.pattern.permute.xlu0 %v1187_v3  ;;  %v1139_v5 = vld [vmem:[%s1438_s2 + $0x28] sm:$0xff]  ;;  %v1138_v6 = vld [vmem:[%s1438_s2 + $0x20] sm:$0xff]  ;;  %v1137_v7 = vld [vmem:[%s1438_s2 + $0x18] sm:$0xff]  ;;  %s999_s23 = sshll.u32 %s1449_s30, 2  ;;  %vm573_vm7 = vcmask 516096   ;;  %v1189_v0 = vmov 0.0  }
   0xf   : > { %643 = vperm.xlu0 %1173, %v637_v4   ;;  %1174 = vset.pattern.permute.xlu1 %v1187_v3  ;;  %v638_v8 = vld [vmem:[%s1446_s10 + $0x8] sm:$0xff]  ;;  %v639_v9 = vld [vmem:[%s1446_s10 + $0x10] sm:$0xff]  ;;  %v640_v12 = vld [vmem:[%s1446_s10 + $0x18] sm:$0xff]  ;;  %s399_s12 = scalar_lea.vmem %s1436_s0, %s999_s23  ;;  %s405_s30 = scalar_lea.vmem %s1437_s1, %s999_s23  ;;  %574 = vst.msk [vmem:[#allocation2] sm:$0x1] %vm573_vm7, %v1189_v0  ;;  %vm576_vm10 = vcmask 1040896  }
  0x10   : > { %542 = vmatpush.bf16.msra.mxu1 %v1141_v1  ;;  %1175 = vset.pattern.permute.xlu2 %v1187_v3  ;;  %v1136_v10 = vld [vmem:[%s1438_s2 + $0x10] sm:$0xff]  ;;  %v1135_v11 = vld [vmem:[%s1438_s2 + $0x8] sm:$0xff]  ;;  %v1134_v13 = vld [vmem:[%s1438_s2] sm:$0xff]  ;;  %577 = vst.msk [vmem:[#allocation2 + $0x3f] sm:$0x1] %vm576_vm10, %v1189_v0  ;;  %vm594_vm11 = vcmask 1048064  }
  0x11   : > { %653 = vperm.xlu1 %1174, %v639_v9   ;;  %v1142_v14 = vld [vmem:[%s399_s12] sm:$0xff]  ;;  %v1143_v16 = vld [vmem:[%s399_s12 + $0x8] sm:$0xff]  ;;  %v606_v37 = vld [vmem:[%s1445_s9 + $0x10] sm:$0xff]  ;;  %vm681_vm12 = vcmask 1048065   ;;  %vm635_vm13 = vcmask 522240   ;;  %s1451_s20 = smov (!%p407_p4, %s1259_s20), 1 }
  0x12   : > { %496 = vmatpush.bf16.msra.mxu0 %v1140_v2  ;;  %v1144_v15 = vld [vmem:[%s405_s30] sm:$0xff]  ;;  %v1145_v17 = vld [vmem:[%s405_s30 + $0x8] sm:$0xff]  ;;  %v607_v42 = vld [vmem:[%s1445_s9 + $0x18] sm:$0xff]  ;;  %s1002_s16 = sshll.u32 %s1451_s20, 3 }
  0x13   : > { %v604_v18 = vld [vmem:[%s1445_s9] sm:$0xff]  ;;  %v605_v19 = vld [vmem:[%s1445_s9 + $0x8] sm:$0xff]  ;;  %v1153_v53 = vld [vmem:[%s1440_s4 + $0x38] sm:$0xff]  ;;  %s410_s21 = scalar_lea.vmem %s1447_s11, %s1002_s16 }
  0x14   : > { %543 = vmatpush.bf16.msra.mxu1 %v1140_v2  ;;  %610 = vperm.xlu2 %1175, %v604_v18   ;;  %v1315_v20 = vld [vmem:[%s1439_s3] ss:$0 sm:$0xff]  ;;  %v1152_v56 = vld [vmem:[%s1440_s4 + $0x30] sm:$0xff]  ;;  %v1161_v58 = vld [vmem:[%s1440_s4 + $0x78] sm:$0xff] }
  0x15   : > { %846 = vmatpush.bf16.msra.mxu3 %v1153_v53  ;;  %v1151_v59 = vld [vmem:[%s1440_s4 + $0x28] sm:$0xff]  ;;  %779 = vmatpush.bf16.msra.mxu2 %v1161_v58  ;;  %v1160_v61 = vld [vmem:[%s1440_s4 + $0x70] sm:$0xff]  ;;  %v1150_v63 = vld [vmem:[%s1440_s4 + $0x20] sm:$0xff] }
  0x16   : > { %497 = vmatpush.bf16.msra.mxu0 %v1139_v5  ;;  %v1159_v1 = vld [vmem:[%s1440_s4 + $0x68] sm:$0xff]  ;;  %v1149_v2 = vld [vmem:[%s1440_s4 + $0x18] sm:$0xff]  ;;  %v1158_v3 = vld [vmem:[%s1440_s4 + $0x60] sm:$0xff] }
  0x17   : > { %648 = vperm.xlu0 %1173, %v638_v8   ;;  %v1148_v8 = vld [vmem:[%s1440_s4 + $0x10] sm:$0xff] }
  0x18   : > { %544 = vmatpush.bf16.msra.mxu1 %v1139_v5 }
  0x19   : > { %658 = vperm.xlu1 %1174, %v640_v12   ;;  %847 = vmatpush.bf16.msra.mxu3 %v1152_v56 }
  0x1a   : > { %498 = vmatpush.bf16.msra.mxu0 %v1138_v6  ;;  %780 = vmatpush.bf16.msra.mxu2 %v1160_v61 }
  0x1c   : > { %545 = vmatpush.bf16.msra.mxu1 %v1138_v6  ;;  %615 = vperm.xlu2 %1175, %v605_v19  }
  0x1d   : > { %848 = vmatpush.bf16.msra.mxu3 %v1151_v59 }
  0x1e   : > { %499 = vmatpush.bf16.msra.mxu0 %v1137_v7  ;;  %781 = vmatpush.bf16.msra.mxu2 %v1159_v1 }
  0x20   : > { %546 = vmatpush.bf16.msra.mxu1 %v1137_v7 }
  0x21   : > { %849 = vmatpush.bf16.msra.mxu3 %v1150_v63  ;;  %v888_v63 = vld [vmem:[%s1442_s6 + $0x18] sm:$0xff] }
  0x22   : > { %500 = vmatpush.bf16.msra.mxu0 %v1136_v10  ;;  %782 = vmatpush.bf16.msra.mxu2 %v1158_v3  ;;  %v887_v3 = vld [vmem:[%s1442_s6 + $0x10] sm:$0xff] }
  0x24   : > { %547 = vmatpush.bf16.msra.mxu1 %v1136_v10  ;;  %v1157_v10 = vld [vmem:[%s1440_s4 + $0x58] sm:$0xff] }
  0x25   : > { %850 = vmatpush.bf16.msra.mxu3 %v1149_v2 }
  0x26   : > { %501 = vmatpush.bf16.msra.mxu0 %v1135_v11  ;;  %783 = vmatpush.bf16.msra.mxu2 %v1157_v10  ;;  %v885_v10 = vld [vmem:[%s1442_s6] sm:$0xff] }
  0x28   : > { %548 = vmatpush.bf16.msra.mxu1 %v1135_v11  ;;  %v1147_v11 = vld [vmem:[%s1440_s4 + $0x8] sm:$0xff] }
  0x29   : > { %851 = vmatpush.bf16.msra.mxu3 %v1148_v8 }
  0x2a   : > { %502 = vmatpush.bf16.msra.mxu0 %v1134_v13 }
  0x2c   : > { %549 = vmatpush.bf16.msra.mxu1 %v1134_v13  ;;  %v1156_v13 = vld [vmem:[%s1440_s4 + $0x50] sm:$0xff] }
  0x2d   : > { %503 = vmatmul.bf16.vlgmr.msra.gmra.mxu0 %v1142_v14  ;;  %852 = vmatpush.bf16.msra.mxu3 %v1147_v11 }
  0x2e   : > { %784 = vmatpush.bf16.msra.mxu2 %v1156_v13  ;;  %v893_v13 = vld [vmem:[%s1444_s8] sm:$0xff] }
  0x2f   : > { %550 = vmatmul.bf16.vlgmr.msra.gmra.mxu1 %v1144_v15  ;;  %v1146_v15 = vld [vmem:[%s1440_s4] sm:$0xff] }
  0x31   : > { %853 = vmatpush.bf16.msra.mxu3 %v1146_v15 }
  0x3d   : > { %508 = vmatmul.bf16.gmra.mxu0 %v1143_v16  ;;  %v1155_v16 = vld [vmem:[%s1440_s4 + $0x48] sm:$0xff] }
  0x3e   : > { %785 = vmatpush.bf16.msra.mxu2 %v1155_v16  ;;  %v1178_v16 = vld [vmem:[#allocation3] ss:$0 sm:$0xff] }
  0x3f   : > { %555 = vmatmul.bf16.gmra.mxu1 %v1145_v17  ;;  %v1154_v17 = vld [vmem:[%s1440_s4 + $0x40] sm:$0xff] }
  0x42   : > { %786 = vmatpush.bf16.msra.mxu2 %v1154_v17 }
  0x6e   : > { %v611_v5 = vpop.permute.xlu2 %610 }
  0x76   : > { %v616_v12 = vpop.permute.xlu2 %615 }
  0x81   : > { %v644_v26 = vpop.permute.xlu0 %643 }
  0x83   : > { %v654_v35 = vpop.permute.xlu1 %653 }
  0x89   : > { %v649_v33 = vpop.permute.xlu0 %648 }
  0x8b   : > { %v659_v44 = vpop.permute.xlu1 %658 }
  0xaa   : > { %v504_v21 = vpop.f32.mrf.mxu0 }
  0xab   : > { %v505_v22 = vadd.f32 %v1315_v20, %v504_v21 }
  0xac   : > { %v551_v47 = vpop.f32.mrf.mxu1 }
  0xad   : > { %v518_v23 = vmul.f32 0.2, %v505_v22  ;;  %vm514_vm0 = vcmp.ge.f32.partialorder %v505_v22, 0.0  ;;  %v552_v48 = vadd.f32 %v1315_v20, %v551_v47 }
  0xaf   : > { %v522_v24 = vsel %vm514_vm0, %v505_v22, %v518_v23  ;;  %v565_v49 = vmul.f32 0.2, %v552_v48  ;;  %vm561_vm4 = vcmp.ge.f32.partialorder %v552_v48, 0.0 }
  0xb0   : > { %582 = vrot.lane.b32.xlu0 %v522_v24, %s1188_s7  ;;  %v661_v29 = vmul.f32 %v644_v26, %v522_v24 }
  0xb1   : > { %v1336_v50 = vsel %vm561_vm4, %v552_v48, %v565_v49 }
  0xb2   : > { %v506_v25 = vpop.f32.mrf.mxu0  ;;  %600 = vst.msk [vmem:[#allocation2 + $0x20] sm:$0xff] %vm599_vm5, %v1336_v50  ;;  %v628_v23 = vmul.f32 %v611_v5, %v1336_v50 }
  0xb3   : > { %v507_v27 = vadd.f32 %v1315_v20, %v506_v25 }
  0xb4   : > { %v553_v51 = vpop.f32.mrf.mxu1 }
  0xb5   : > { %v519_v28 = vmul.f32 0.2, %v507_v27  ;;  %vm515_vm1 = vcmp.ge.f32.partialorder %v507_v27, 0.0  ;;  %v554_v52 = vadd.f32 %v1315_v20, %v553_v51  ;;  %v1177_v51 = vld [vmem:[%s1441_s5] ss:$0 sm:$0xff] }
  0xb7   : > { %v523_v30 = vsel %vm515_vm1, %v507_v27, %v519_v28  ;;  %vm562_vm6 = vcmp.ge.f32.partialorder %v554_v52, 0.0  ;;  %v566_v54 = vmul.f32 0.2, %v554_v52 }
  0xb8   : > { %584 = vrot.lane.b32.xlu1 %v523_v30, %s1188_s7  ;;  %669 = vrot.lane.b32.xlu0 %v661_v29, %s1188_s7  ;;  %v662_v36 = vmul.f32 %v649_v33, %v523_v30 }
  0xb9   : > { %v1344_v55 = vsel %vm562_vm6, %v554_v52, %v566_v54 }
  0xba   : > { %v509_v31 = vpop.f32.mrf.mxu0  ;;  %601 = vst.msk [vmem:[#allocation2 + $0x28] sm:$0xff] %vm599_vm5, %v1344_v55  ;;  %v629_v25 = vmul.f32 %v616_v12, %v1344_v55 }
  0xbb   : > { %v510_v32 = vadd.f32 %v1315_v20, %v509_v31 }
  0xbc   : > { %v556_v57 = vpop.f32.mrf.mxu1 }
  0xbd   : > { %v520_v34 = vmul.f32 0.2, %v510_v32  ;;  %vm516_vm2 = vcmp.ge.f32.partialorder %v510_v32, 0.0  ;;  %v557_v60 = vadd.f32 %v1315_v20, %v556_v57 }
  0xbf   : > { %v524_v38 = vsel %vm516_vm2, %v510_v32, %v520_v34  ;;  %v567_v62 = vmul.f32 0.2, %v557_v60  ;;  %vm563_vm8 = vcmp.ge.f32.partialorder %v557_v60, 0.0  ;;  %vm894_vm2 = vcmask 261120  }
  0xc0   : > { %586 = vrot.lane.b32.xlu2 %v524_v38, %s1188_s7  ;;  %671 = vrot.lane.b32.xlu1 %v662_v36, %s1188_s7  ;;  %v663_v43 = vmul.f32 %v654_v35, %v524_v38 }
  0xc1   : > { %620 = vperm.xlu0 %1173, %v606_v37   ;;  %v571_v4 = vsel %vm563_vm8, %v557_v60, %v567_v62 }
  0xc2   : > { %v511_v39 = vpop.f32.mrf.mxu0  ;;  %602 = vst.msk [vmem:[#allocation2 + $0x30] sm:$0xff] %vm599_vm5, %v571_v4 }
  0xc3   : > { %v512_v40 = vadd.f32 %v1315_v20, %v511_v39 }
  0xc4   : > { %v558_v6 = vpop.f32.mrf.mxu1 }
  0xc5   : > { %v521_v41 = vmul.f32 0.2, %v512_v40  ;;  %vm517_vm3 = vcmp.ge.f32.partialorder %v512_v40, 0.0  ;;  %v559_v7 = vadd.f32 %v1315_v20, %v558_v6 }
  0xc7   : > { %v525_v45 = vsel %vm517_vm3, %v512_v40, %v521_v41  ;;  %v568_v9 = vmul.f32 0.2, %v559_v7  ;;  %vm564_vm9 = vcmp.ge.f32.partialorder %v559_v7, 0.0  ;;  %vm926_vm3 = vcmask 7168  }
  0xc8   : > { %v664_v46 = vmul.f32 %v659_v44, %v525_v45  ;;  %673 = vrot.lane.b32.xlu2 %v663_v43, %s1188_s7  ;;  %625 = vperm.xlu1 %1174, %v607_v42  }
  0xc9   : > { %v572_v14 = vsel %vm564_vm9, %v559_v7, %v568_v9  ;;  %v886_v7 = vld [vmem:[%s1442_s6 + $0x8] sm:$0xff] }
  0xca   : > { %675 = vrot.lane.b32.xlu0 %v664_v46, %s1188_s7  ;;  %603 = vst.msk [vmem:[#allocation2 + $0x38] sm:$0xff] %vm599_vm5, %v572_v14 }
  0xd0   : > { %588 = vrot.lane.b32.xlu2 %v525_v45, %s1188_s7 }
 0x11a   : > { %v587_v18 = vpop.permute.xlu2 %586 }
 0x11b   : > { %597 = vst.msk [vmem:[#allocation2 + $0x10] sm:$0xff] %vm594_vm11, %v587_v18 }
 0x122   : > { %v674_v19 = vpop.permute.xlu2 %673  ;;  %v583_v20 = vpop.permute.xlu0 %582 }
 0x123   : > { %595 = vst.msk [vmem:[#allocation2] sm:$0xff] %vm594_vm11, %v583_v20 }
 0x124   : > { %684 = vst.msk [vmem:[#allocation2 + $0x2f] sm:$0xff] %vm594_vm11, %v674_v19 }
 0x12a   : > { %v589_v21 = vpop.permute.xlu2 %588  ;;  %v585_v22 = vpop.permute.xlu1 %584 }
 0x12b   : > { %598 = vst.msk [vmem:[#allocation2 + $0x18] sm:$0xff] %vm594_vm11, %v589_v21  ;;  %v670_v24 = vpop.permute.xlu0 %669 }
 0x12c   : > { %596 = vst.msk [vmem:[#allocation2 + $0x8] sm:$0xff] %vm594_vm11, %v585_v22 }
 0x12d   : > { %632 = vst.msk [vmem:[#allocation2 + $0x1] sm:$0xff] %vm599_vm5, %v628_v23 }
 0x12e   : > { %633 = vst.msk [vmem:[#allocation2 + $0x9] sm:$0xff] %vm599_vm5, %v629_v25 }
 0x12f   : > { %682 = vst.msk [vmem:[#allocation2 + $0x1f] sm:$0xfe] %vm681_vm12, %v670_v24 }
 0x132   : > { %v672_v26 = vpop.permute.xlu1 %671 }
 0x133   : > { %683 = vst.msk [vmem:[#allocation2 + $0x27] sm:$0xff] %vm594_vm11, %v672_v26  ;;  %v621_v27 = vpop.permute.xlu0 %620 }
 0x134   : > { %v630_v28 = vmul.f32 %v621_v27, %v571_v4  ;;  %v686_v29 = vld [vmem:[#allocation2] sm:$0xff] }
 0x135   : > { %v687_v30 = vld [vmem:[#allocation2 + $0x8] sm:$0xff] }
 0x136   : > { %634 = vst.msk [vmem:[#allocation2 + $0x11] sm:$0xff] %vm599_vm5, %v630_v28  ;;  %v690_v31 = vpack.c.bf16 %v687_v30, %v686_v29 }
 0x138   : > { %854 = vmatmul.bf16.vlgmr.msra.gmra.mxu3 %v690_v31 }
 0x13a   : > { %v626_v32 = vpop.permute.xlu1 %625  ;;  %v708_v33 = vld [vmem:[#allocation2 + $0x20] sm:$0xff]  ;;  %v709_v34 = vld [vmem:[#allocation2 + $0x28] sm:$0xff] }
 0x13b   : > { %v631_v35 = vmul.f32 %v626_v32, %v572_v14  ;;  %v712_v36 = vpack.c.bf16 %v709_v34, %v708_v33 }
 0x13c   : > { %v676_v37 = vpop.permute.xlu0 %675 }
 0x13d   : > { %636 = vst.msk [vmem:[#allocation2 + $0x19] sm:$0x7f] %vm635_vm13, %v631_v35  ;;  %787 = vmatmul.bf16.vlgmr.msra.gmra.mxu2 %v712_v36  ;;  %v688_v38 = vld [vmem:[#allocation2 + $0x10] sm:$0xff] }
 0x13e   : > { %685 = vst.msk [vmem:[#allocation2 + $0x37] sm:$0xff] %vm594_vm11, %v676_v37 }
 0x144   : > { %v689_v39 = vld [vmem:[#allocation2 + $0x18] sm:$0xff] }
 0x145   : > { %v691_v40 = vpack.c.bf16 %v689_v39, %v688_v38  ;;  %v710_v41 = vld [vmem:[#allocation2 + $0x30] sm:$0xff]  ;;  %v711_v42 = vld [vmem:[#allocation2 + $0x38] sm:$0xff] }
 0x146   : > { %v713_v43 = vpack.c.bf16 %v711_v42, %v710_v41 }
 0x148   : > { %859 = vmatmul.bf16.gmra.mxu3 %v691_v40 }
 0x14d   : > { %792 = vmatmul.bf16.gmra.mxu2 %v713_v43 }
 0x1bb   : > { %v855_v44 = vpop.f32.mrf.mxu3 }
 0x1c0   : > { %v788_v45 = vpop.f32.mrf.mxu2 }
 0x1c1   : > { %v856_v53 = vadd.f32 %v855_v44, %v788_v45 }
 0x1c3   : > { %v857_v46 = vpop.f32.mrf.mxu3  ;;  %v869_v59 = vadd.f32 %v1177_v51, %v856_v53 }
 0x1c5   : > { %v877_v4 = vmul.f32 0.2, %v869_v59  ;;  %vm873_vm1 = vcmp.ge.f32.partialorder %v869_v59, 0.0 }
 0x1c7   : > { %v881_v9 = vsel %vm873_vm1, %v869_v59, %v877_v4 }
 0x1c8   : > { %v790_v47 = vpop.f32.mrf.mxu2  ;;  %v889_v12 = vmul.f32 %v885_v10, %v881_v9 }
 0x1c9   : > { %v858_v52 = vadd.f32 %v857_v46, %v790_v47 }
 0x1cb   : > { %v860_v48 = vpop.f32.mrf.mxu3  ;;  %v870_v57 = vadd.f32 %v1177_v51, %v858_v52 }
 0x1cd   : > { %v878_v0 = vmul.f32 0.2, %v870_v57  ;;  %vm874_vm0 = vcmp.ge.f32.partialorder %v870_v57, 0.0 }
 0x1cf   : > { %v882_v6 = vsel %vm874_vm0, %v870_v57, %v878_v0 }
 0x1d0   : > { %v793_v49 = vpop.f32.mrf.mxu2  ;;  %v890_v11 = vmul.f32 %v886_v7, %v882_v6 }
 0x1d1   : > { %v861_v50 = vadd.f32 %v860_v48, %v793_v49 }
 0x1d3   : > { %v871_v54 = vadd.f32 %v1177_v51, %v861_v50  ;;  %v862_v55 = vpop.f32.mrf.mxu3 }
 0x1d5   : > { %v879_v61 = vmul.f32 0.2, %v871_v54  ;;  %vm875_vm14 = vcmp.ge.f32.partialorder %v871_v54, 0.0 }
 0x1d7   : > { %v883_v2 = vsel %vm875_vm14, %v871_v54, %v879_v61 }
 0x1d8   : > { %v795_v56 = vpop.f32.mrf.mxu2  ;;  %v891_v8 = vmul.f32 %v887_v3, %v883_v2 }
 0x1d9   : > { %v863_v58 = vadd.f32 %v862_v55, %v795_v56 }
 0x1db   : > { %v872_v60 = vadd.f32 %v1177_v51, %v863_v58 }
 0x1dd   : > { %vm876_vm15 = vcmp.ge.f32.partialorder %v872_v60, 0.0  ;;  %v880_v62 = vmul.f32 0.2, %v872_v60 }
 0x1df   : > { %v884_v1 = vsel %vm876_vm15, %v872_v60, %v880_v62 }
 0x1e0   : > { %v892_v5 = vmul.f32 %v888_v63, %v884_v1 }
 0x1e2   : > { %910 = vmatpush.msrb.mxu0 %v892_v5 }
 0x1e4   : > { %911 = vmatpush.msrb.mxu0 %v891_v8 }
 0x1e6   : > { %912 = vmatpush.msrb.mxu0 %v890_v11 }
 0x1e8   : > { %913 = vmatpush.msrb.mxu0 %v889_v12 }
 0x1e9   : > { %1131 = vmatmul.msk.f32.vlgmr.msrb.gmra.mxu0 %vm894_vm2, %v893_v13 }
 0x266   : > { %v915_v14 = vpop.f32.mrf.mxu0 }
 0x267   : > { %v918_v15 = vsel %vm599_vm5, %v915_v14, 0.0 }
 0x268   : > { %919 = vadd.xlane.f32.xlu1 %v918_v15 }
 0x2db   : > { %v920_v17 = vpop.xlane.xlu1 %919 }
 0x2dc   : > { %v925_v18 = vadd.f32 %v1178_v16, %v920_v17 }
 0x2de   : > { %927 = vst.msk [vmem:[%s410_s21] sm:$0xff] %vm926_vm3, %v925_v18 }
 0x2df PF: > { %s23_s19 = sadd.s32 1, %s1185_s19  }
 0x2e0   : > { %p20_p5 = scmp.ge.s32.totalorder %s23_s19, 4  }
 0x2e2   :  { %22 = sbr.rel (!%p20_p5) target bundleno = 3 (0x3), region = 99 }

</bundles_post_ra>
